<compile_context>
chip_gen: v7x
topology: tpu7x:2x2x1
jax: 0.10.0
libtpu: 0.0.40
codegen_flags: <defaults>
</compile_context>

<pallas_src>
import functools

import jax
import jax.numpy as jnp
from jax.experimental import pallas as pl
from jax.experimental.pallas import tpu as pltpu

EPS = 1e-5                        # PyTorch BatchNorm2d default
VMEM_LIMIT = 32 * 1024 * 1024     # explicit scoped-VMEM limit (review item)


def _round_up(x, m):
    return (x + m - 1) // m * m


def _pick_images_per_step(n, rows_per_image, target_rows=128):
    """Images per grid step so the pointwise matmul M-dim approaches >=128
    (fills the MXU, amortizes per-step overhead).  Must divide N."""
    nb = max(1, min(n, -(-target_rows // max(rows_per_image, 1))))
    while n % nb:
        nb -= 1
    return nb


@functools.lru_cache(maxsize=None)
def _roll_is_numpy_convention():
    """One-time on-device probe: does pltpu.roll follow np.roll semantics
    (out[i] = in[i - shift])?  Used to pick the lane-shift sign."""
    def k(x_ref, o_ref):
        o_ref[...] = pltpu.roll(x_ref[...], 1, axis=1)
    x = jnp.tile(jnp.arange(128, dtype=jnp.float32), (8, 1))
    out = pl.pallas_call(
        k, out_shape=jax.ShapeDtypeStruct((8, 128), jnp.float32))(x)
    return bool(out[0, 0] == 127.0)


# ---------------------------------------------------------------------------
# Fused stage kernel (lane-folded layout, NB images per grid step):
#   affine(=folded BN) -> ReLU -> zero-halo VMEM scratch -> depthwise KxK conv
#   (W-taps via aligned lane rolls) -> 1x1 pointwise conv + W-stride subsample
#   as ONE matmul (M = NB*H_out) -> per-block BatchNorm partial sums.
# ---------------------------------------------------------------------------
def _sep_stage_kernel(x_ref, dwt_ref, p_ref, scale_ref, shift_ref,
                      y_ref, stats_ref, zbuf,
                      *, K, pad, stride, H, H_out, NB, Lpad, WC, lane_shifts,
                      mxu_dtype):
    Hrows = zbuf.shape[1]
    Lout = y_ref.shape[-1]

    # folded per-channel affine (BN of the previous stage) + ReLU: lane-dense.
    z = jnp.maximum(x_ref[...] * scale_ref[...] + shift_ref[...], 0.0)

    # Re-zero only the halo strips each step (interior is overwritten below).
    # Not under pl.when(pid == 0): under megacore partitioning each core has
    # its own scratch, so a "first step only" init would leave one core dirty.
    if pad > 0:
        zbuf[:, 0:pad, :] = jnp.zeros((NB, pad, Lpad), jnp.float32)
    if Hrows > pad + H:
        zbuf[:, pad + H:Hrows, :] = jnp.zeros((NB, Hrows - pad - H, Lpad),
                                              jnp.float32)
    if Lpad > WC:
        zbuf[:, pad:pad + H, WC:Lpad] = jnp.zeros((NB, H, Lpad - WC),
                                                  jnp.float32)
    # Interior at lane offset 0: aligned full-vreg stores.  The left/right
    # W-halos are realized by the lane roll wrapping through the zero tail.
    zbuf[:, pad:pad + H, 0:WC] = z

    zp = zbuf[...]
    acc = jnp.zeros((NB * H_out, Lpad), jnp.float32)
    for ki in range(K):
        # TODO(synk): for stride > 1 this strided sublane slice materializes a
        # copy per tap; restructure at larger shapes.
        rows = zp[:, ki:ki + stride * (H_out - 1) + 1:stride, :]
        rows = rows.reshape(NB * H_out, Lpad)
        for kj in range(K):
            sh = lane_shifts[kj]
            shifted = pltpu.roll(rows, shift=sh, axis=1) if sh else rows
            acc = acc + shifted * dwt_ref[ki * K + kj, :]

    # 1x1 pointwise conv (+ W-stride subsample) as one lane-dense MXU matmul;
    # operands go to the MXU in mxu_dtype (bf16 on v6e/v7x), f32 accumulation.
    y = jnp.dot(acc.astype(mxu_dtype), p_ref[...],
                preferred_element_type=jnp.float32)
    y_ref[...] = y.reshape(NB, H_out, Lout)

    # BatchNorm partial sums for this block, emitted with a single store.
    # (E[x^2]-mean^2 is folded in f32 glue; fine at these magnitudes.)
    stats_ref[0] = jnp.concatenate(
        [jnp.sum(y, axis=0, keepdims=True),
         jnp.sum(y * y, axis=0, keepdims=True)], axis=0)


def fused_sep_stage(x_folded, dw, pw, scale, shift, *, stride, pad, H, W,
                    channel_major_out, mxu_dtype):
    """x_folded: (N, H, W*C) lane-folded NHWC (channel-minor).
    dw: (K, K, C); pw: (C, Co); scale/shift: (C,) pre-ReLU affine.
    Returns (y (N, H_out, Lout), stats (G, 2, Lout), H_out, W_out)."""
    N = x_folded.shape[0]
    K, _, C = dw.shape
    Co = pw.shape[1]
    WC = W * C
    H_out = (H + 2 * pad - K) // stride + 1
    W_out = (W + 2 * pad - K) // stride + 1
    W1 = W + 2 * pad - K + 1                      # stride-1 depthwise width
    Lout = Co * W_out if channel_major_out else W_out * Co

    # scratch geometry: lane dim multiple of 128 with a zero tail >= pad*C
    # lanes (halo source for the rolls); sublane dim multiple of 8.
    Lpad = _round_up(max(WC, (W + pad) * C), 128)
    Hrows = _round_up(H + 2 * pad, 8)
    assert Lpad >= (W + pad) * C

    nb = _pick_images_per_step(N, H_out)
    G = N // nb

    # Depthwise taps broadcast across the folded lane dim (kept f32 for VPU).
    reps = -(-Lpad // C)
    dwt = jnp.tile(dw.reshape(K * K, C).astype(jnp.float32),
                   (1, reps))[:, :Lpad]

    # Pointwise conv + W-stride subsample as one (Lpad, Lout) matrix.
    # Rows past W1*C and rows for non-selected w1 positions are zero, so the
    # halo/garbage columns of acc never reach the output.
    sel = jnp.zeros((W1, W_out), jnp.float32)
    sel = sel.at[stride * jnp.arange(W_out), jnp.arange(W_out)].set(1.0)
    if channel_major_out:
        P = jnp.einsum('xw,cd->xcdw', sel, pw).reshape(W1 * C, Co * W_out)
    else:
        P = jnp.einsum('xw,cd->xcwd', sel, pw).reshape(W1 * C, W_out * Co)
    P = jnp.pad(P, ((0, Lpad - W1 * C), (0, 0))).astype(mxu_dtype)

    # per-channel affine broadcast across W in the folded lane dim
    scale_t = jnp.tile(scale.astype(jnp.float32), (W,)).reshape(1, WC)
    shift_t = jnp.tile(shift.astype(jnp.float32), (W,)).reshape(1, WC)

    # lane shifts per W-tap (sign chosen by the roll-convention probe)
    numpy_conv = _roll_is_numpy_convention()
    lane_shifts = tuple(
        ((pad - kj) * C if numpy_conv else (kj - pad) * C) % Lpad
        for kj in range(K))

    kernel = functools.partial(
        _sep_stage_kernel, K=K, pad=pad, stride=stride, H=H, H_out=H_out,
        NB=nb, Lpad=Lpad, WC=WC, lane_shifts=lane_shifts, mxu_dtype=mxu_dtype)

    y, stats = pl.pallas_call(
        kernel,
        out_shape=(jax.ShapeDtypeStruct((N, H_out, Lout), jnp.float32),
                   jax.ShapeDtypeStruct((G, 2, Lout), jnp.float32)),
        grid=(G,),
        in_specs=[
            pl.BlockSpec((nb, H, WC), lambda g: (g, 0, 0)),
            pl.BlockSpec((K * K, Lpad), lambda g: (0, 0)),
            pl.BlockSpec((Lpad, Lout), lambda g: (0, 0)),
            pl.BlockSpec((1, WC), lambda g: (0, 0)),
            pl.BlockSpec((1, WC), lambda g: (0, 0)),
        ],
        out_specs=(pl.BlockSpec((nb, H_out, Lout), lambda g: (g, 0, 0)),
                   pl.BlockSpec((1, 2, Lout), lambda g: (g, 0, 0))),
        scratch_shapes=[pltpu.VMEM((nb, Hrows, Lpad), jnp.float32)],
        compiler_params=pltpu.CompilerParams(
            dimension_semantics=("parallel",),
            vmem_limit_bytes=VMEM_LIMIT),
    )(x_folded, dwt, P, scale_t, shift_t)
    return y, stats, H_out, W_out


# ---------------------------------------------------------------------------
# Final BN affine fused with the folded-NHWC (channel-major) -> NCHW transpose
# ---------------------------------------------------------------------------
def _bn_nchw_kernel(y_ref, scale_ref, shift_ref, o_ref, *, C_out, W_out):
    z = y_ref[...] * scale_ref[...] + shift_ref[...]      # (NB, H, C_out*W_out)
    for c in range(C_out):
        o_ref[:, c, :, :] = z[:, :, c * W_out:(c + 1) * W_out]


def bn_affine_to_nchw(y, scale, shift, *, C_out, W_out):
    """y: (N, H, C_out*W_out) channel-major folded layout -> (N, C_out, H, W)."""
    N, H2, L = y.shape
    nb = _pick_images_per_step(N, H2)
    G = N // nb
    scale_t = jnp.repeat(scale.astype(jnp.float32), W_out).reshape(1, L)
    shift_t = jnp.repeat(shift.astype(jnp.float32), W_out).reshape(1, L)
    return pl.pallas_call(
        functools.partial(_bn_nchw_kernel, C_out=C_out, W_out=W_out),
        out_shape=jax.ShapeDtypeStruct((N, C_out, H2, W_out), jnp.float32),
        grid=(G,),
        in_specs=[pl.BlockSpec((nb, H2, L), lambda g: (g, 0, 0)),
                  pl.BlockSpec((1, L), lambda g: (0, 0)),
                  pl.BlockSpec((1, L), lambda g: (0, 0))],
        out_specs=pl.BlockSpec((nb, C_out, H2, W_out), lambda g: (g, 0, 0, 0)),
        compiler_params=pltpu.CompilerParams(
            dimension_semantics=("parallel",),
            vmem_limit_bytes=VMEM_LIMIT),
    )(y, scale_t, shift_t)


# ---------------------------------------------------------------------------
# BatchNorm scale/shift from fused per-block partial sums (tiny f32 glue)
# ---------------------------------------------------------------------------
def _bn_from_stats(stats, gamma, beta, *, count, n_ch, n_sp, channel_major):
    s = jnp.sum(stats, axis=0)                            # (2, Lout)
    if channel_major:
        s = s.reshape(2, n_ch, n_sp).sum(axis=2)          # (2, C)
    else:
        s = s.reshape(2, n_sp, n_ch).sum(axis=1)
    mean = s[0] / count
    var = jnp.maximum(s[1] / count - mean * mean, 0.0)    # biased var
    scale = gamma / jnp.sqrt(var + EPS)
    shift = beta - mean * scale
    return scale, shift


# ---------------------------------------------------------------------------
# Full SepConv forward (NCHW in / NCHW out, like the PyTorch module)
# ---------------------------------------------------------------------------
def sepconv_forward(x_nchw, params, *, stride, pad, mxu_dtype=jnp.bfloat16):
    dw1, pw1, g1, b1, dw2, pw2, g2, b2 = params
    N, C_in, H, W = x_nchw.shape
    C_out = pw2.shape[1]

    # pad channels to a multiple of 8 so the folded lane dim is dense;
    # padded channels carry exact zeros through both stages.
    Cp = _round_up(C_in, 8)
    pc = Cp - C_in

    def padc(a, axis):
        if pc == 0:
            return a
        widths = [(0, 0)] * a.ndim
        widths[axis] = (0, pc)
        return jnp.pad(a, widths)

    dw1p, dw2p = padc(dw1, 2), padc(dw2, 2)
    pw1p = padc(padc(pw1, 0), 1)                       # (Cp, Cp)
    pw2p = padc(pw2, 0)                                # (Cp, C_out)
    # gamma padded with ZEROS so padded channels get scale = shift = 0 after
    # BN1 (robustness fix from review), not 1/sqrt(eps).
    g1p, b1p = padc(g1, 0), padc(b1, 0)

    # NCHW -> lane-folded NHWC (one tiny XLA transpose at the input boundary)
    x = jnp.transpose(x_nchw, (0, 2, 3, 1))
    x = padc(x, 3).reshape(N, H, W * Cp)

    ones = jnp.ones((Cp,), jnp.float32)
    zeros = jnp.zeros((Cp,), jnp.float32)

    # stage 1: ReLU -> dwconv(stride) -> 1x1 conv (+ BN1 partial sums);
    # channel-minor output so it feeds stage 2 directly.
    y1, st1, H1, W1o = fused_sep_stage(x, dw1p, pw1p, ones, zeros,
                                       stride=stride, pad=pad, H=H, W=W,
                                       channel_major_out=False,
                                       mxu_dtype=mxu_dtype)
    s1, t1 = _bn_from_stats(st1, g1p, b1p, count=N * H1 * W1o,
                            n_ch=Cp, n_sp=W1o, channel_major=False)

    # stage 2: BN1 -> ReLU -> dwconv(1) -> 1x1 conv(->C_out) (+ BN2 sums);
    # channel-MAJOR output so the epilogue needs no permutation.
    y2, st2, H2, W2o = fused_sep_stage(y1, dw2p, pw2p, s1, t1,
                                       stride=1, pad=pad, H=H1, W=W1o,
                                       channel_major_out=True,
                                       mxu_dtype=mxu_dtype)
    s2, t2 = _bn_from_stats(st2, g2, b2, count=N * H2 * W2o,
                            n_ch=C_out, n_sp=W2o, channel_major=True)

    # final BN2 affine fused with the folded-NHWC -> NCHW output transpose
    return bn_affine_to_nchw(y2, s2, t2, C_out=C_out, W_out=W2o)


# ---------------------------------------------------------------------------
# Pure-JAX reference (mirrors the PyTorch module exactly, NCHW).
# pw_dtype controls the 1x1-conv operand dtype so the bf16-MXU kernel path can
# be checked against a matched reference.
# ---------------------------------------------------------------------------
def ref_forward(x, params, *, stride, pad, pw_dtype=jnp.float32):
    dw1, pw1, g1, b1, dw2, pw2, g2, b2 = params

    def dwconv(h, w_kkc, s):
        C = h.shape[1]
        w = jnp.transpose(w_kkc, (2, 0, 1))[:, None, :, :]        # (C,1,K,K)
        return jax.lax.conv_general_dilated(h, w, (s, s),
                                            [(pad, pad), (pad, pad)],
                                            feature_group_count=C)

    def pwconv(h, w_io):
        w = w_io.T[:, :, None, None].astype(pw_dtype)             # (Co,Ci,1,1)
        return jax.lax.conv_general_dilated(h.astype(pw_dtype), w, (1, 1),
                                            [(0, 0), (0, 0)],
                                            preferred_element_type=jnp.float32)

    def bn(h, gamma, beta):
        mean = h.mean(axis=(0, 2, 3), keepdims=True)
        var = h.var(axis=(0, 2, 3), keepdims=True)                # biased
        return ((h - mean) / jnp.sqrt(var + EPS)
                * gamma[None, :, None, None] + beta[None, :, None, None])

    h = jax.nn.relu(x)
    h = pwconv(dwconv(h, dw1, stride), pw1)
    h = jax.nn.relu(bn(h, g1, b1))
    h = pwconv(dwconv(h, dw2, 1), pw2)
    return bn(h, g2, b2)


if __name__ == "__main__":
    N, C_in, C_out, H, W = 2, 4, 8, 16, 16
    k, stride, pad = 3, 1, 1

    key = jax.random.PRNGKey(0)
    k0, k1, k2, k3, k4 = jax.random.split(key, 5)
    x = jax.random.normal(k0, (N, C_in, H, W), jnp.float32)

    # deterministic synthetic parameters (PyTorch shapes, stored channels-last)
    dw1 = 0.2 * jax.random.normal(k1, (k, k, C_in), jnp.float32)   # (C_in,1,k,k)
    pw1 = 0.2 * jax.random.normal(k2, (C_in, C_in), jnp.float32)   # (C_in,C_in,1,1)
    dw2 = 0.2 * jax.random.normal(k3, (k, k, C_in), jnp.float32)
    pw2 = 0.2 * jax.random.normal(k4, (C_in, C_out), jnp.float32)  # (C_out,C_in,1,1)
    g1, b1 = jnp.ones((C_in,), jnp.float32), jnp.zeros((C_in,), jnp.float32)
    g2, b2 = jnp.ones((C_out,), jnp.float32), jnp.zeros((C_out,), jnp.float32)
    params = (dw1, pw1, g1, b1, dw2, pw2, g2, b2)

    # exact-path check: f32 MXU operands vs. the pure-f32 reference.
    out32 = jax.block_until_ready(
        sepconv_forward(x, params, stride=stride, pad=pad,
                        mxu_dtype=jnp.float32))
    ref32 = ref_forward(x, params, stride=stride, pad=pad,
                        pw_dtype=jnp.float32)
    err32 = float(jnp.max(jnp.abs(out32 - ref32)))
    assert out32.shape == (N, C_out, H, W), out32.shape
    assert err32 < 2e-3, f"f32 path max abs err {err32}"

    # bf16-MXU path (review: native bf16 MXU on v6e/v7x) vs. a reference that
    # rounds the 1x1-conv operands to bf16 the same way.
    outbf = jax.block_until_ready(
        sepconv_forward(x, params, stride=stride, pad=pad,
                        mxu_dtype=jnp.bfloat16))
    refbf = ref_forward(x, params, stride=stride, pad=pad,
                        pw_dtype=jnp.bfloat16)
    errbf = float(jnp.max(jnp.abs(outbf - refbf)))
    assert outbf.shape == (N, C_out, H, W), outbf.shape
    assert errbf < 1e-2, f"bf16 path max abs err {errbf}"

    print("KERNEL_OK")
</pallas_src>

<mosaic_0001>
module attributes {stable_mosaic.version = 11 : i64} {
  func.func @k(%arg0: memref<8x128xf32, #tpu.memory_space<vmem>>, %arg1: memref<8x128xf32, #tpu.memory_space<vmem>>) attributes {dimension_semantics = [], scalar_prefetch = 0 : i64, scratch_operands = 0 : i64, tpu.core_type = #tpu.core_type<tc>} {
    %c0 = arith.constant 0 : index
    %c0_0 = arith.constant 0 : index
    %0 = vector.load %arg0[%c0, %c0_0] : memref<8x128xf32, #tpu.memory_space<vmem>>, vector<8x128xf32>
    %c1_i32 = arith.constant 1 : i32
    %1 = tpu.dynamic_rotate %0 by %c1_i32 dim 1 : vector<8x128xf32>, i32 -> vector<8x128xf32>
    %c0_1 = arith.constant 0 : index
    %c0_2 = arith.constant 0 : index
    %2 = vector.load %arg1[%c0_1, %c0_2] : memref<8x128xf32, #tpu.memory_space<vmem>>, vector<8x128xf32>
    tpu.vector_store %arg1[%c0_1, %c0_2], %1 {strides = array<i32>} : memref<8x128xf32, #tpu.memory_space<vmem>>, vector<8x128xf32>,
    return
  }
}

</mosaic_0001>

<bundles_post_ra>
// kernel: tpu_custom_call.1
= control target key start
LH: loop header
LB: loop body
LE: loop exit
PB: predicated region body
PF: predicated region fallthrough
CT: control target
= control target key end

     0   :  { %6 = vsyncpa [#allocation3], 0  ;;  %s128_s0 = inlined_call_operand.hbm [shape: f32[8,128], index: 0, kind: input, shape index: {}]   ;;  %s129_s1 = inlined_call_operand.hbm [shape: f32[8,128], index: 1, kind: output, shape index: {}]  }
   0x1   :  { %7 = vsyncpa [#allocation4], 0  ;;  %s91_s6 = smov [#allocation2]   ;;  %s43_s10 = scalar_lea.hbm %s128_s0, 128 }
   0x2   :  { %s14_s7 = sshll.u32 %s91_s6, 4  ;;  %p44_p0 = scmp.ne.s32.totalorder %s128_s0, %s43_s10  ;;  %s15_s7 = int_to_ptr.vmem [resolvable:$true] %s14_s7 }
   0x3   :  { %p47_p1 = scmp.lt.u32.totalorder %s43_s10, %s128_s0 }
   0x5   :  { %p49_p2 = pnand %p47_p1, %p44_p0 }
   0x7   :  { %52 = shalt.err (!%p49_p2)
}
   0x8   :  { %s53_s15 = scalar_lea.vmem %s15_s7, 128  ;;  %p58_p4 = scmp.lt.s32.totalorder %s15_s7, %s15_s7 }
   0x9   :  { %p54_p3 = scmp.ne.s32.totalorder %s15_s7, %s53_s15  ;;  %p59_p5 = scmp.lt.s32.totalorder %s53_s15, %s53_s15 }
   0xb   :  { %p60_p6 = por %p59_p5, %p58_p4 }
   0xd   :  { %p61_p7 = pnand %p60_p6, %p54_p3 }
   0xf   :  { %64 = shalt.err (!%p61_p7)
}
  0x10   :  { %17 = dma.hbm_to_vmem [thread:$0]  %s128_s0, 128, %s15_s7, [#allocation3]  }
  0x11   :  { %87 = dma.done.wait [#allocation3], 128  }
  0x12   :  { %88 = vsyncadd [#allocation3], 4294967168  ;;  %v21_v0 = vld [vmem:[#allocation2] sm:$0xff]  ;;  %s92_s18 = smov 1   ;;  %s93_s19 = smov [#allocation5]  }
  0x13   :  { %22 = vrot.lane.b32.xlu0 %v21_v0, %s92_s18  ;;  %s31_s20 = sshll.u32 %s93_s19, 4  ;;  %s32_s20 = int_to_ptr.vmem [resolvable:$true] %s31_s20 }
  0x14   :  { %s65_s21 = scalar_lea.vmem %s32_s20, 128  ;;  %p70_p9 = scmp.lt.s32.totalorder %s32_s20, %s32_s20 }
  0x15   :  { %p66_p8 = scmp.ne.s32.totalorder %s32_s20, %s65_s21  ;;  %p71_p10 = scmp.lt.s32.totalorder %s65_s21, %s65_s21 }
  0x17   :  { %p72_p11 = por %p71_p10, %p70_p9 }
  0x19   :  { %p73_p12 = pnand %p72_p11, %p66_p8 }
  0x85   :  { %v23_v1 = vpop.permute.xlu0 %22 }
  0x86   :  { %24 = vst [vmem:[#allocation5] sm:$0xff] %v23_v1 }
  0x87   :  { %76 = shalt.err (!%p73_p12)
}
  0x88   :  { %s77_s0 = scalar_lea.hbm %s129_s1, 128 }
  0x89   :  { %p78_p13 = scmp.ne.s32.totalorder %s129_s1, %s77_s0  ;;  %p81_p0 = scmp.lt.u32.totalorder %s77_s0, %s129_s1 }
  0x8b   :  { %p83_p1 = pnand %p81_p0, %p78_p13 }
  0x8d   :  { %86 = shalt.err (!%p83_p1)
}
  0x8e   :  { %34 = dma.vmem_to_hbm [thread:$0]  %s32_s20, 128, %s129_s1, [#allocation4]  }
  0x8f   :  { %89 = dma.done.wait [#allocation4], 128  }
  0x90   :  { %90 = vsyncadd [#allocation4], 4294967168 }
  0x91   :  { %38 = vsyncpa [#allocation3], 1 }
  0x92   :  { %39 = vsyncpa [#allocation4], 1 }

</bundles_post_ra>
